<compile_context>
chip_gen: v7x
topology: tpu7x:2x2x1
jax: 0.10.0
libtpu: 0.0.40
codegen_flags: <defaults>
</compile_context>

<pallas_src>
import functools

import jax
import jax.numpy as jnp
from jax import lax
from jax.experimental import pallas as pl
from jax.experimental.pallas import tpu as pltpu

K = 5
STRIDE = 2
PAD = (K - 1) // 2          # = 2
OUT_PAD = STRIDE - 1        # = 1

# For output phase e (0 = even, 1 = odd) and padded-window start s in {0,1,2},
# the ConvTranspose2d kernel index that multiplies x at that offset (None = no tap):
#   out[2i]   = W[4]*x[i-1] + W[2]*x[i] + W[0]*x[i+1]
#   out[2i+1] =               W[3]*x[i] + W[1]*x[i+1]
_TAP = ({0: 4, 1: 2, 2: 0}, {1: 3, 2: 1})


def _build_phase_weights(w_pt):
    """w_pt: (Cin, Cout, K, K) ConvTranspose2d weight -> (4*Cout, 9*Cin) matrix.

    Row block p = 2*eh + ew holds phase (eh, ew); column index (sr*3+sc)*Cin + ci
    matches the im2col patch built inside the kernel. Missing taps stay zero.
    """
    cin, cout = w_pt.shape[0], w_pt.shape[1]
    w_all = jnp.zeros((4 * cout, 9 * cin), w_pt.dtype)
    for eh in range(2):
        for ew in range(2):
            p = 2 * eh + ew
            for sr in range(3):
                kh = _TAP[eh].get(sr)
                if kh is None:
                    continue
                for sc in range(3):
                    kw = _TAP[ew].get(sc)
                    if kw is None:
                        continue
                    blk = jnp.transpose(w_pt[:, :, kh, kw])          # (Cout, Cin)
                    w_all = w_all.at[p * cout:(p + 1) * cout,
                                     (sr * 3 + sc) * cin:(sr * 3 + sc + 1) * cin].set(blk)
    return w_all


def _deconv_igdn_kernel(x_ref, w_ref, g_ref, b_ref, o_ref, patch_ref, *,
                        cin, cout, wpad, s):
    """One batch element per grid step.

    x_ref    : (1, Cin, LPAD)      flattened (H+2, W+2)-padded input
    w_ref    : (4*Cout, 9*Cin)     per-phase tap weights (zero-padded)
    g_ref    : (Cout, Cout)        IGDN gamma
    b_ref    : (Cout, 1)           IGDN beta
    o_ref    : (1, 4, Cout, S)     per-phase outputs, S = H*(W+2) (2 junk cols/row)
    patch_ref: (9*Cin, S)          VMEM im2col scratch
    """
    # im2col: patch[(sr*3+sc)*cin + ci, q] = xflat[ci, q + sr*(W+2) + sc]
    for sr in range(3):
        for sc in range(3):
            t = sr * 3 + sc
            patch_ref[pl.ds(t * cin, cin), :] = x_ref[0, :, pl.ds(sr * wpad + sc, s)]

    # One deep MXU contraction for all 4 phases: (4*Cout, 9*Cin) @ (9*Cin, S).
    z_all = jnp.dot(w_ref[...], patch_ref[...], preferred_element_type=jnp.float32)

    gamma = g_ref[...]
    beta = b_ref[...]
    for p in range(4):                                   # static unroll over phases
        z = z_all[p * cout:(p + 1) * cout, :]            # (Cout, S), lane-dense
        norm = jnp.dot(gamma, z * z, preferred_element_type=jnp.float32) + beta
        o_ref[0, p] = (z * jnp.sqrt(norm)).astype(o_ref.dtype)


def transposed_conv(x_nchw, w_pt, gamma, beta, *, compute_dtype=jnp.float32):
    """x_nchw: (N, Cin, H, W); w_pt: (Cin, Cout, K, K) ConvTranspose2d weight;
    gamma: (Cout, Cout); beta: (Cout,). Returns (N, Cout, 2H, 2W)."""
    n, cin, h, w = x_nchw.shape
    cout = w_pt.shape[1]
    wpad = w + 2
    s = h * wpad                       # flattened per-phase spatial extent
    lraw = (h + 2) * wpad
    lpad = lraw + 2                    # slack so every tap slice [d, d+s) is in bounds

    # ---- glue: pad by 1, flatten spatial (no zero-insertion, no scatter) ----
    xpad = jnp.pad(x_nchw, ((0, 0), (0, 0), (1, 1), (1, 1)))
    xflat = jnp.pad(xpad.reshape(n, cin, lraw),
                    ((0, 0), (0, 0), (0, lpad - lraw))).astype(compute_dtype)
    w_all = _build_phase_weights(w_pt).astype(compute_dtype)       # (4*Cout, 9*Cin)
    gamma_m = gamma.astype(jnp.float32)
    beta_c = beta.reshape(cout, 1).astype(jnp.float32)

    kernel = functools.partial(_deconv_igdn_kernel,
                               cin=cin, cout=cout, wpad=wpad, s=s)
    z = pl.pallas_call(
        kernel,
        out_shape=jax.ShapeDtypeStruct((n, 4, cout, s), x_nchw.dtype),
        grid_spec=pltpu.PrefetchScalarGridSpec(
            num_scalar_prefetch=0,
            grid=(n,),
            in_specs=[
                pl.BlockSpec((1, cin, lpad), lambda b: (b, 0, 0)),
                pl.BlockSpec((4 * cout, 9 * cin), lambda b: (0, 0)),
                pl.BlockSpec((cout, cout), lambda b: (0, 0)),
                pl.BlockSpec((cout, 1), lambda b: (0, 0)),
            ],
            out_specs=pl.BlockSpec((1, 4, cout, s), lambda b: (b, 0, 0, 0)),
            scratch_shapes=[pltpu.VMEM((9 * cin, s), compute_dtype)],
        ),
        compiler_params=pltpu.CompilerParams(dimension_semantics=("parallel",)),
    )(xflat, w_all, gamma_m, beta_c)

    # ---- glue: drop the 2 junk columns per row and interleave the 4 phases ----
    z = z.reshape(n, 2, 2, cout, h, wpad)[..., :w]                 # (N,2,2,Cout,H,W)
    out = jnp.transpose(z, (0, 3, 4, 1, 5, 2)).reshape(n, cout, 2 * h, 2 * w)
    return out


def _reference(x_nchw, w_pt, gamma, beta):
    """Pure-JAX reference of the same semantics (for validation)."""
    lo = K - 1 - PAD
    hi = K - 1 - PAD + OUT_PAD
    w_oihw = jnp.transpose(w_pt[:, :, ::-1, ::-1], (1, 0, 2, 3))   # (Cout, Cin, K, K)
    z = lax.conv_general_dilated(
        x_nchw, w_oihw, window_strides=(1, 1),
        padding=((lo, hi), (lo, hi)),
        lhs_dilation=(STRIDE, STRIDE),
        dimension_numbers=("NCHW", "OIHW", "NCHW"))
    norm = jnp.einsum("nchw,oc->nohw", z * z, gamma) + beta[None, :, None, None]
    return z * jnp.sqrt(norm)


if __name__ == "__main__":
    # Small deterministic setup: N=2, Cin=4, Cout=8, H=W=16  ->  out (2, 8, 32, 32)
    key = jax.random.PRNGKey(0)
    kx, kw = jax.random.split(key)
    N, CIN, COUT, H, W = 2, 4, 8, 16, 16

    x = jax.random.normal(kx, (N, CIN, H, W), dtype=jnp.float32)
    # ConvTranspose2d weight: (in_channels, out_channels, kH, kW)
    w_pt = 0.1 * jax.random.normal(kw, (CIN, COUT, K, K), dtype=jnp.float32)
    # IGDN parameters (standard GDN init): beta = 1, gamma = 0.1 * I
    gamma = 0.1 * jnp.eye(COUT, dtype=jnp.float32)
    beta = jnp.ones((COUT,), dtype=jnp.float32)

    out = transposed_conv(x, w_pt, gamma, beta)
    jax.block_until_ready(out)

    ref = _reference(x, w_pt, gamma, beta)
    assert out.shape == (N, COUT, H * STRIDE, W * STRIDE), out.shape
    max_err = float(jnp.max(jnp.abs(out - ref)))
    scale = float(jnp.max(jnp.abs(ref))) + 1e-6
    assert max_err <= 1e-2 * scale + 1e-2, f"mismatch: max_err={max_err}"

    # TODO(synk): lmda_cond branch (ConditionalLayer) omitted — default
    # construction uses lmda_cond=False so forward never touches it.
    print("KERNEL_OK")
</pallas_src>

<mosaic_0001>
module attributes {stable_mosaic.version = 11 : i64} {
  func.func @_deconv_igdn_kernel(%arg0: i32, %arg1: memref<1x4x326xf32, #tpu.memory_space<vmem>>, %arg2: memref<32x36xf32, #tpu.memory_space<vmem>>, %arg3: memref<8x8xf32, #tpu.memory_space<vmem>>, %arg4: memref<8x1xf32, #tpu.memory_space<vmem>>, %arg5: memref<1x4x8x288xf32, #tpu.memory_space<vmem>>, %arg6: memref<36x288xf32, #tpu.memory_space<vmem>>) attributes {dimension_semantics = [#tpu.dimension_semantics<parallel>], iteration_bounds = array<i64: 2>, scalar_prefetch = 0 : i64, scratch_operands = 1 : i64, tpu.core_type = #tpu.core_type<tc>, window_params = [{transform_indices = @transform_0, window_bounds = array<i64: 1, 4, 326>}, {pipeline_mode = #tpu.pipeline_mode<synchronous>, transform_indices = @transform_1, window_bounds = array<i64: 32, 36>}, {pipeline_mode = #tpu.pipeline_mode<synchronous>, transform_indices = @transform_2, window_bounds = array<i64: 8, 8>}, {pipeline_mode = #tpu.pipeline_mode<synchronous>, transform_indices = @transform_3, window_bounds = array<i64: 8, 1>}, {transform_indices = @transform_4, window_bounds = array<i64: 1, 4, 8, 288>}]} {
    %c0 = arith.constant 0 : index
    %c0_0 = arith.constant 0 : index
    %c0_1 = arith.constant 0 : index
    %0 = vector.load %arg1[%c0, %c0_0, %c0_1] : memref<1x4x326xf32, #tpu.memory_space<vmem>>, vector<1x4x288xf32>
    %1 = vector.shape_cast %0 : vector<1x4x288xf32> to vector<4x288xf32>
    %c0_2 = arith.constant 0 : index
    %c0_3 = arith.constant 0 : index
    %2 = vector.load %arg6[%c0_2, %c0_3] : memref<36x288xf32, #tpu.memory_space<vmem>>, vector<4x288xf32>
    tpu.vector_store %arg6[%c0_2, %c0_3], %1 {strides = array<i32>} : memref<36x288xf32, #tpu.memory_space<vmem>>, vector<4x288xf32>,
    %c0_4 = arith.constant 0 : index
    %c0_5 = arith.constant 0 : index
    %c1 = arith.constant 1 : index
    %3 = vector.load %arg1[%c0_4, %c0_5, %c1] : memref<1x4x326xf32, #tpu.memory_space<vmem>>, vector<1x4x288xf32>
    %4 = vector.shape_cast %3 : vector<1x4x288xf32> to vector<4x288xf32>
    %c4 = arith.constant 4 : index
    %c0_6 = arith.constant 0 : index
    %5 = vector.load %arg6[%c4, %c0_6] : memref<36x288xf32, #tpu.memory_space<vmem>>, vector<4x288xf32>
    tpu.vector_store %arg6[%c4, %c0_6], %4 {strides = array<i32>} : memref<36x288xf32, #tpu.memory_space<vmem>>, vector<4x288xf32>,
    %c0_7 = arith.constant 0 : index
    %c0_8 = arith.constant 0 : index
    %c2 = arith.constant 2 : index
    %6 = vector.load %arg1[%c0_7, %c0_8, %c2] : memref<1x4x326xf32, #tpu.memory_space<vmem>>, vector<1x4x288xf32>
    %7 = vector.shape_cast %6 : vector<1x4x288xf32> to vector<4x288xf32>
    %c8 = arith.constant 8 : index
    %c0_9 = arith.constant 0 : index
    %8 = vector.load %arg6[%c8, %c0_9] : memref<36x288xf32, #tpu.memory_space<vmem>>, vector<4x288xf32>
    tpu.vector_store %arg6[%c8, %c0_9], %7 {strides = array<i32>} : memref<36x288xf32, #tpu.memory_space<vmem>>, vector<4x288xf32>,
    %c0_10 = arith.constant 0 : index
    %c0_11 = arith.constant 0 : index
    %c18 = arith.constant 18 : index
    %9 = vector.load %arg1[%c0_10, %c0_11, %c18] : memref<1x4x326xf32, #tpu.memory_space<vmem>>, vector<1x4x288xf32>
    %10 = vector.shape_cast %9 : vector<1x4x288xf32> to vector<4x288xf32>
    %c12 = arith.constant 12 : index
    %c0_12 = arith.constant 0 : index
    %11 = vector.load %arg6[%c12, %c0_12] : memref<36x288xf32, #tpu.memory_space<vmem>>, vector<4x288xf32>
    tpu.vector_store %arg6[%c12, %c0_12], %10 {strides = array<i32>} : memref<36x288xf32, #tpu.memory_space<vmem>>, vector<4x288xf32>,
    %c0_13 = arith.constant 0 : index
    %c0_14 = arith.constant 0 : index
    %c19 = arith.constant 19 : index
    %12 = vector.load %arg1[%c0_13, %c0_14, %c19] : memref<1x4x326xf32, #tpu.memory_space<vmem>>, vector<1x4x288xf32>
    %13 = vector.shape_cast %12 : vector<1x4x288xf32> to vector<4x288xf32>
    %c16 = arith.constant 16 : index
    %c0_15 = arith.constant 0 : index
    %14 = vector.load %arg6[%c16, %c0_15] : memref<36x288xf32, #tpu.memory_space<vmem>>, vector<4x288xf32>
    tpu.vector_store %arg6[%c16, %c0_15], %13 {strides = array<i32>} : memref<36x288xf32, #tpu.memory_space<vmem>>, vector<4x288xf32>,
    %c0_16 = arith.constant 0 : index
    %c0_17 = arith.constant 0 : index
    %c20 = arith.constant 20 : index
    %15 = vector.load %arg1[%c0_16, %c0_17, %c20] : memref<1x4x326xf32, #tpu.memory_space<vmem>>, vector<1x4x288xf32>
    %16 = vector.shape_cast %15 : vector<1x4x288xf32> to vector<4x288xf32>
    %c20_18 = arith.constant 20 : index
    %c0_19 = arith.constant 0 : index
    %17 = vector.load %arg6[%c20_18, %c0_19] : memref<36x288xf32, #tpu.memory_space<vmem>>, vector<4x288xf32>
    tpu.vector_store %arg6[%c20_18, %c0_19], %16 {strides = array<i32>} : memref<36x288xf32, #tpu.memory_space<vmem>>, vector<4x288xf32>,
    %c0_20 = arith.constant 0 : index
    %c0_21 = arith.constant 0 : index
    %c36 = arith.constant 36 : index
    %18 = vector.load %arg1[%c0_20, %c0_21, %c36] : memref<1x4x326xf32, #tpu.memory_space<vmem>>, vector<1x4x288xf32>
    %19 = vector.shape_cast %18 : vector<1x4x288xf32> to vector<4x288xf32>
    %c24 = arith.constant 24 : index
    %c0_22 = arith.constant 0 : index
    %20 = vector.load %arg6[%c24, %c0_22] : memref<36x288xf32, #tpu.memory_space<vmem>>, vector<4x288xf32>
    tpu.vector_store %arg6[%c24, %c0_22], %19 {strides = array<i32>} : memref<36x288xf32, #tpu.memory_space<vmem>>, vector<4x288xf32>,
    %c0_23 = arith.constant 0 : index
    %c0_24 = arith.constant 0 : index
    %c37 = arith.constant 37 : index
    %21 = vector.load %arg1[%c0_23, %c0_24, %c37] : memref<1x4x326xf32, #tpu.memory_space<vmem>>, vector<1x4x288xf32>
    %22 = vector.shape_cast %21 : vector<1x4x288xf32> to vector<4x288xf32>
    %c28 = arith.constant 28 : index
    %c0_25 = arith.constant 0 : index
    %23 = vector.load %arg6[%c28, %c0_25] : memref<36x288xf32, #tpu.memory_space<vmem>>, vector<4x288xf32>
    tpu.vector_store %arg6[%c28, %c0_25], %22 {strides = array<i32>} : memref<36x288xf32, #tpu.memory_space<vmem>>, vector<4x288xf32>,
    %c0_26 = arith.constant 0 : index
    %c0_27 = arith.constant 0 : index
    %c38 = arith.constant 38 : index
    %24 = vector.load %arg1[%c0_26, %c0_27, %c38] : memref<1x4x326xf32, #tpu.memory_space<vmem>>, vector<1x4x288xf32>
    %25 = vector.shape_cast %24 : vector<1x4x288xf32> to vector<4x288xf32>
    %c32 = arith.constant 32 : index
    %c0_28 = arith.constant 0 : index
    %26 = vector.load %arg6[%c32, %c0_28] : memref<36x288xf32, #tpu.memory_space<vmem>>, vector<4x288xf32>
    tpu.vector_store %arg6[%c32, %c0_28], %25 {strides = array<i32>} : memref<36x288xf32, #tpu.memory_space<vmem>>, vector<4x288xf32>,
    %c0_29 = arith.constant 0 : index
    %c0_30 = arith.constant 0 : index
    %27 = vector.load %arg2[%c0_29, %c0_30] : memref<32x36xf32, #tpu.memory_space<vmem>>, vector<32x36xf32>
    %c0_31 = arith.constant 0 : index
    %c0_32 = arith.constant 0 : index
    %28 = vector.load %arg6[%c0_31, %c0_32] : memref<36x288xf32, #tpu.memory_space<vmem>>, vector<36x288xf32>
    %cst = arith.constant dense<0.000000e+00> : vector<32x288xf32>
    %29 = tpu.matmul %27, %28, %cst {dimension_numbers = #tpu.dot_dimension_numbers<[1], [0], [0], [1], [0, 0, 1, 1], [], []>} : vector<32x36xf32>, vector<36x288xf32>, vector<32x288xf32> -> vector<32x288xf32>
    %c0_33 = arith.constant 0 : index
    %c0_34 = arith.constant 0 : index
    %30 = vector.load %arg3[%c0_33, %c0_34] : memref<8x8xf32, #tpu.memory_space<vmem>>, vector<8x8xf32>
    %c0_35 = arith.constant 0 : index
    %c0_36 = arith.constant 0 : index
    %31 = vector.load %arg4[%c0_35, %c0_36] : memref<8x1xf32, #tpu.memory_space<vmem>>, vector<8x1xf32>
    %32 = vector.extract_strided_slice %29 {offsets = [0, 0], sizes = [8, 288], strides = [1, 1]} : vector<32x288xf32> to vector<8x288xf32>
    %33 = arith.mulf %32, %32 : vector<8x288xf32>
    %cst_37 = arith.constant dense<0.000000e+00> : vector<8x288xf32>
    %34 = tpu.matmul %30, %33, %cst_37 {dimension_numbers = #tpu.dot_dimension_numbers<[1], [0], [0], [1], [0, 0, 1, 1], [], []>} : vector<8x8xf32>, vector<8x288xf32>, vector<8x288xf32> -> vector<8x288xf32>
    %35 = vector.broadcast %31 : vector<8x1xf32> to vector<8x288xf32>
    %36 = arith.addf %34, %35 : vector<8x288xf32>
    %37 = math.sqrt %36 : vector<8x288xf32>
    %38 = arith.mulf %32, %37 : vector<8x288xf32>
    %c0_38 = arith.constant 0 : index
    %c0_39 = arith.constant 0 : index
    %c0_40 = arith.constant 0 : index
    %c0_41 = arith.constant 0 : index
    %39 = vector.load %arg5[%c0_38, %c0_39, %c0_40, %c0_41] : memref<1x4x8x288xf32, #tpu.memory_space<vmem>>, vector<1x1x8x288xf32>
    %40 = vector.shape_cast %39 : vector<1x1x8x288xf32> to vector<8x288xf32>
    %41 = vector.shape_cast %38 : vector<8x288xf32> to vector<1x1x8x288xf32>
    tpu.vector_store %arg5[%c0_38, %c0_39, %c0_40, %c0_41], %41 {strides = array<i32>} : memref<1x4x8x288xf32, #tpu.memory_space<vmem>>, vector<1x1x8x288xf32>,
    %42 = vector.extract_strided_slice %29 {offsets = [8, 0], sizes = [8, 288], strides = [1, 1]} : vector<32x288xf32> to vector<8x288xf32>
    %43 = arith.mulf %42, %42 : vector<8x288xf32>
    %cst_42 = arith.constant dense<0.000000e+00> : vector<8x288xf32>
    %44 = tpu.matmul %30, %43, %cst_42 {dimension_numbers = #tpu.dot_dimension_numbers<[1], [0], [0], [1], [0, 0, 1, 1], [], []>} : vector<8x8xf32>, vector<8x288xf32>, vector<8x288xf32> -> vector<8x288xf32>
    %45 = vector.broadcast %31 : vector<8x1xf32> to vector<8x288xf32>
    %46 = arith.addf %44, %45 : vector<8x288xf32>
    %47 = math.sqrt %46 : vector<8x288xf32>
    %48 = arith.mulf %42, %47 : vector<8x288xf32>
    %c0_43 = arith.constant 0 : index
    %c1_44 = arith.constant 1 : index
    %c0_45 = arith.constant 0 : index
    %c0_46 = arith.constant 0 : index
    %49 = vector.load %arg5[%c0_43, %c1_44, %c0_45, %c0_46] : memref<1x4x8x288xf32, #tpu.memory_space<vmem>>, vector<1x1x8x288xf32>
    %50 = vector.shape_cast %49 : vector<1x1x8x288xf32> to vector<8x288xf32>
    %51 = vector.shape_cast %48 : vector<8x288xf32> to vector<1x1x8x288xf32>
    tpu.vector_store %arg5[%c0_43, %c1_44, %c0_45, %c0_46], %51 {strides = array<i32>} : memref<1x4x8x288xf32, #tpu.memory_space<vmem>>, vector<1x1x8x288xf32>,
    %52 = vector.extract_strided_slice %29 {offsets = [16, 0], sizes = [8, 288], strides = [1, 1]} : vector<32x288xf32> to vector<8x288xf32>
    %53 = arith.mulf %52, %52 : vector<8x288xf32>
    %cst_47 = arith.constant dense<0.000000e+00> : vector<8x288xf32>
    %54 = tpu.matmul %30, %53, %cst_47 {dimension_numbers = #tpu.dot_dimension_numbers<[1], [0], [0], [1], [0, 0, 1, 1], [], []>} : vector<8x8xf32>, vector<8x288xf32>, vector<8x288xf32> -> vector<8x288xf32>
    %55 = vector.broadcast %31 : vector<8x1xf32> to vector<8x288xf32>
    %56 = arith.addf %54, %55 : vector<8x288xf32>
    %57 = math.sqrt %56 : vector<8x288xf32>
    %58 = arith.mulf %52, %57 : vector<8x288xf32>
    %c0_48 = arith.constant 0 : index
    %c2_49 = arith.constant 2 : index
    %c0_50 = arith.constant 0 : index
    %c0_51 = arith.constant 0 : index
    %59 = vector.load %arg5[%c0_48, %c2_49, %c0_50, %c0_51] : memref<1x4x8x288xf32, #tpu.memory_space<vmem>>, vector<1x1x8x288xf32>
    %60 = vector.shape_cast %59 : vector<1x1x8x288xf32> to vector<8x288xf32>
    %61 = vector.shape_cast %58 : vector<8x288xf32> to vector<1x1x8x288xf32>
    tpu.vector_store %arg5[%c0_48, %c2_49, %c0_50, %c0_51], %61 {strides = array<i32>} : memref<1x4x8x288xf32, #tpu.memory_space<vmem>>, vector<1x1x8x288xf32>,
    %62 = vector.extract_strided_slice %29 {offsets = [24, 0], sizes = [8, 288], strides = [1, 1]} : vector<32x288xf32> to vector<8x288xf32>
    %63 = arith.mulf %62, %62 : vector<8x288xf32>
    %cst_52 = arith.constant dense<0.000000e+00> : vector<8x288xf32>
    %64 = tpu.matmul %30, %63, %cst_52 {dimension_numbers = #tpu.dot_dimension_numbers<[1], [0], [0], [1], [0, 0, 1, 1], [], []>} : vector<8x8xf32>, vector<8x288xf32>, vector<8x288xf32> -> vector<8x288xf32>
    %65 = vector.broadcast %31 : vector<8x1xf32> to vector<8x288xf32>
    %66 = arith.addf %64, %65 : vector<8x288xf32>
    %67 = math.sqrt %66 : vector<8x288xf32>
    %68 = arith.mulf %62, %67 : vector<8x288xf32>
    %c0_53 = arith.constant 0 : index
    %c3 = arith.constant 3 : index
    %c0_54 = arith.constant 0 : index
    %c0_55 = arith.constant 0 : index
    %69 = vector.load %arg5[%c0_53, %c3, %c0_54, %c0_55] : memref<1x4x8x288xf32, #tpu.memory_space<vmem>>, vector<1x1x8x288xf32>
    %70 = vector.shape_cast %69 : vector<1x1x8x288xf32> to vector<8x288xf32>
    %71 = vector.shape_cast %68 : vector<8x288xf32> to vector<1x1x8x288xf32>
    tpu.vector_store %arg5[%c0_53, %c3, %c0_54, %c0_55], %71 {strides = array<i32>} : memref<1x4x8x288xf32, #tpu.memory_space<vmem>>, vector<1x1x8x288xf32>,
    return
  }
  func.func @transform_0(%arg0: i32) -> (i32, i32, i32) {
    %c0_i32 = arith.constant 0 : i32
    %c0_i32_0 = arith.constant 0 : i32
    %c0_i32_1 = arith.constant 0 : i32
    return %arg0, %c0_i32, %c0_i32_0 : i32, i32, i32
  }
  func.func @transform_1(%arg0: i32) -> (i32, i32) {
    %c0_i32 = arith.constant 0 : i32
    %c0_i32_0 = arith.constant 0 : i32
    %c0_i32_1 = arith.constant 0 : i32
    return %c0_i32, %c0_i32_0 : i32, i32
  }
  func.func @transform_2(%arg0: i32) -> (i32, i32) {
    %c0_i32 = arith.constant 0 : i32
    %c0_i32_0 = arith.constant 0 : i32
    %c0_i32_1 = arith.constant 0 : i32
    return %c0_i32, %c0_i32_0 : i32, i32
  }
  func.func @transform_3(%arg0: i32) -> (i32, i32) {
    %c0_i32 = arith.constant 0 : i32
    %c0_i32_0 = arith.constant 0 : i32
    %c0_i32_1 = arith.constant 0 : i32
    return %c0_i32, %c0_i32_0 : i32, i32
  }
  func.func @transform_4(%arg0: i32) -> (i32, i32, i32, i32) {
    %c0_i32 = arith.constant 0 : i32
    %c0_i32_0 = arith.constant 0 : i32
    %c0_i32_1 = arith.constant 0 : i32
    %c0_i32_2 = arith.constant 0 : i32
    return %arg0, %c0_i32, %c0_i32_0, %c0_i32_1 : i32, i32, i32, i32
  }
}

</mosaic_0001>

<bundles_post_ra>
// kernel: tpu_custom_call.1
= control target key start
LH: loop header
LB: loop body
LE: loop exit
PB: predicated region body
PF: predicated region fallthrough
CT: control target
= control target key end

     0   :  { %9 = vsyncpa [#allocation4], 0  ;;  %s2268_s0 = inlined_call_operand.hbm [shape: f32[2,4,326], index: 0, kind: input, shape index: {}]   ;;  %s2269_s1 = inlined_call_operand.hbm [shape: f32[32,36], index: 1, kind: input, shape index: {}]   ;;  %s2270_s2 = inlined_call_operand.vmem [shape: f32[8,8], index: 2, kind: input, shape index: {}]   ;;  %s2271_s3 = inlined_call_operand.vmem [shape: f32[8,1], index: 3, kind: input, shape index: {}]   ;;  %s2272_s4 = inlined_call_operand.hbm [shape: f32[2,4,8,288], index: 4, kind: output, shape index: {}]  }
   0x1   :  { %11 = vsyncpa [#allocation4 + $0x1], 0 }
   0x2   :  { %12 = vsyncpa [#allocation7], 0 }
   0x3   :  { %13 = vsyncpa [#allocation5], 0 }
   0x4   :  { %15 = vsyncpa [#allocation5 + $0x1], 0  ;;  %s1803_s15 = smov 0   ;;  %s1805_s16 = smov 0  }
   0x5   :  { %s1807_s17 = smov 0   ;;  %s1809_s18 = smov 0  }
   0x6 LB: > { %s1824_s19 = sadd.s32 4294967295, %s1758_s18   ;;  %s1415_s20 = sadd.s32 4294967294, %s1758_s18   ;;  %s1758_s18 = sphi %s1809_s18, %s2292_s18   ;;  %s1754_s17 = sphi %s1807_s17, %s2291_s17   ;;  %s1750_s16 = sphi %s1805_s16, %s2290_s16   ;;  %s1746_s15 = sphi %s1803_s15, %s2289_s15  }
   0x7   : > { %p41_p0 = scmp.ne.s32.totalorder %s1750_s16, %s1746_s15  ;;  %p2273_p1 = scmp.eq.s32.totalorder %s1824_s19, 0 }
   0x8   : > { %p134_p3 = scmp.eq.s32.totalorder %s1415_s20, 1  ;;  %p1416_p5 = scmp.ge.s32.totalorder %s1758_s18, 1 }
   0x9   : > { %p1833_p4 = por %p2273_p1, %p41_p0  ;;  %p141_p7 = scmp.lt.s32.totalorder %s1758_s18, 3 }
   0xa   : > { %p1838_p6 = por %p134_p3, %p41_p0  ;;  %s1760_s24 = smov [#allocation6]  }
   0xb   : > { %s2276_s21 = scalar_select %p1833_p4, 1, 0 }
   0xc   : > { %s2277_s22 = scalar_select %p1838_p6, 1, 0 }
   0xd   : > { %p1843_p8 = pnand %p1416_p5, %p141_p7  ;;  %s153_s25 = sshll.u32 %s1760_s24, 4  ;;  %s1847_s25 = int_to_ptr.vmem [resolvable:$true] %s153_s25 }
   0xe   : > { %s1859_s27 = sadd.s32 1, %s1758_s18   ;;  %s28_s28 = sadd.s32 1, %s1754_s17 }
   0xf   : > { %s2278_s23 = scalar_select %p1843_p8, 1, 0 }
  0x10   : > { %p1535_p9 = pneg %p1843_p8  ;;  %s25_s29 = ssub.s32 %s1758_s18, %s1859_s27 }
  0x11   : > { %s1630_s6 = scalar_lea.hbm %s2269_s1, 512 }
  0x12   : > { %p1854_p11 = pnand %p1535_p9, %p2273_p1  ;;  %p1631_p12 = scmp.ne.s32.totalorder %s2269_s1, %s1630_s6 }
  0x13   : > { %p1637_p5 = scmp.lt.u32.totalorder %s1630_s6, %s2269_s1 }
  0x14   : > { %p1632_p13 = pneg %p1854_p11 }
  0x16   : > { %p1633_p0 = pnand %p1632_p13, %p1631_p12 }
  0x18   : > { %p1634_p3 = pneg %p1633_p0 }
  0x1a   : > { %p1639_p7 = pnand %p1637_p5, %p1634_p3 }
  0x1c   : > { %1642 = shalt.err (!%p1639_p7)
}
  0x1d   : > { %s1643_s11 = scalar_lea.vmem %s1847_s25, 512  ;;  %p1651_p2 = scmp.lt.s32.totalorder %s1847_s25, %s1847_s25 }
  0x1e   : > { %p1644_p9 = scmp.ne.s32.totalorder %s1847_s25, %s1643_s11  ;;  %p1652_p6 = scmp.lt.s32.totalorder %s1643_s11, %s1643_s11 }
  0x20   : > { %p1646_p10 = pnand %p1644_p9, %p1632_p13  ;;  %p1653_p4 = por %p1652_p6, %p1651_p2 }
  0x22   : > { %p1647_p1 = pneg %p1646_p10 }
  0x24   : > { %p1654_p8 = pnand %p1653_p4, %p1647_p1 }
  0x26   : > { %1657 = shalt.err (!%p1654_p8)
}
  0x27   : > { %s1761_s12 = smov 128   ;;  %s1762_s13 = smov 8  }
  0x28   : > { %1538 = dma.hbm_to_vmem [thread:$0]  (!%p1854_p11), %s2269_s1, 512, %s1847_s25, [#allocation7], %s1761_s12, %s1761_s12, %s1762_s13  }
  0x29   : > { %p26_p2 = scmp.eq.s32.totalorder %s25_s29, 0  ;;  %p35_p1 = scmp.ne.s32.totalorder %s1754_s17, %s1750_s16 }
  0x2a   : > { %p36_p4 = scmp.eq.s32.totalorder %s1758_s18, 0  ;;  %p1548_p6 = scmp.lt.s32.totalorder %s1758_s18, 2 }
  0x2b   : > { %s1890_s24 = scalar_select %p26_p2, %s1754_s17, %s28_s28  }
  0x2c   : > { %p37_p8 = por %p36_p4, %p35_p1  ;;  %p2280_p10 = scmp.eq.s32.totalorder %s1824_s19, 1 }
  0x2d   : > { %s173_s5 = sand.u32 1, %s1754_s17   ;;  %s1523_s6 = smul.u32 192, %s1758_s18 }
  0x2e   : > { %p1894_p12 = por %p2280_p10, %p35_p1  ;;  %s1522_s7 = smul.u32 12, %s173_s5 }
  0x2f   : > { %p1900_p13 = pnand %p1548_p6, %p37_p8  ;;  %s1907_s28 = scalar_lea.hbm %s2268_s0, %s1523_s6 }
  0x30   : > { %s177_s8 = scalar_lea.vmem [#allocation3], %s1522_s7  ;;  %s174_s10 = scalar_lea.sflag [#allocation4], %s173_s5 }
  0x31   : > { %s185_s9 = sshll.u32 %s177_s8, 4  ;;  %s1658_s11 = scalar_lea.hbm %s1907_s28, 192  ;;  %s1909_s9 = int_to_ptr.vmem [resolvable:$true] %s185_s9 }
  0x32   : > { %p1659_p11 = scmp.ne.s32.totalorder %s1907_s28, %s1658_s11  ;;  %p1660_p0 = pneg %p1900_p13 }
  0x33   : > { %s1663_s14 = scalar_lea.hbm %s2268_s0, 384  ;;  %p1664_p7 = scmp.lt.u32.totalorder %s1907_s28, %s2268_s0 }
  0x34   : > { %p1661_p3 = pnand %p1660_p0, %p1659_p11  ;;  %p1665_p9 = scmp.lt.u32.totalorder %s1663_s14, %s1658_s11 }
  0x35   : > { %p1667_p1 = scmp.lt.u32.totalorder %s1658_s11, %s1907_s28 }
  0x36   : > { %p1662_p5 = pneg %p1661_p3  ;;  %p1666_p2 = por %p1665_p9, %p1664_p7 }
  0x38   : > { %p1668_p4 = por %p1667_p1, %p1666_p2 }
  0x3a   : > { %p1669_p6 = pnand %p1668_p4, %p1662_p5 }
  0x3c   : > { %1672 = shalt.err (!%p1669_p6)
}
  0x3d   : > { %s1673_s5 = scalar_lea.vmem %s1909_s9, 192  ;;  %s1763_s7 = smov [#allocation3]  }
  0x3e   : > { %p1674_p8 = scmp.ne.s32.totalorder %s1909_s9, %s1673_s5  ;;  %s1678_s25 = sshll.u32 %s1763_s7, 4  ;;  %s1679_s25 = int_to_ptr.vmem [resolvable:$false] %s1678_s25 }
  0x3f   : > { %s1680_s29 = scalar_lea.vmem %s1679_s25, 384  ;;  %p1681_p3 = scmp.lt.s32.totalorder %s1909_s9, %s1679_s25 }
  0x40   : > { %p1676_p10 = pnand %p1674_p8, %p1660_p0  ;;  %p1682_p7 = scmp.lt.s32.totalorder %s1680_s29, %s1673_s5 }
  0x42   : > { %p1677_p11 = pneg %p1676_p10  ;;  %p1683_p9 = por %p1682_p7, %p1681_p3 }
  0x44   : > { %p1684_p2 = pnand %p1683_p9, %p1677_p11 }
  0x46   : > { %1687 = shalt.err (!%p1684_p2)
}
  0x47   : > { %1542 = dma.hbm_to_vmem [thread:$0]  (!%p1900_p13), %s1907_s28, 192, %s1909_s9, %s174_s10  }
  0x48   : > { %p2283_p5 = scmp.ne.s32.totalorder %s2278_s23, 0 }
  0x49   : > { %s1939_s8 = sand.u32 (!%p2283_p5), 1, %s1750_s16   ;;  %p2284_p0 = scmp.ne.s32.totalorder (!%p2283_p5), %s2276_s21, 0 }
  0x4a   : > { %194 = sbr.rel (%p2283_p5) target bundleno = 736 (0x2e0), region = 36  ;;  %s197_s12 = scalar_lea.sflag (!%p2283_p5), [#allocation4], %s1939_s8 }
  0x4b   : > { %s1524_s11 = smul.u32 (!%p2283_p5), 12, %s1939_s8 }
  0x4d   : > { %s1943_s13 = scalar_lea.vmem (!%p2283_p5), [#allocation3], %s1524_s11 }
  0x51   : > { %1733 = dma.done.wait (%p2284_p0), %s197_s12, 192  }
  0x52   : > { %1735 = vsyncadd (%p2284_p0), %s197_s12, 4294967104  ;;  %p2285_p13 = scmp.eq.s32.totalorder %s1824_s19, 0 }
  0x54   : > { %1737 = dma.done.wait (%p2285_p13), [#allocation7], 512   ;;  %p2286_p1 = pmov %p2285_p13 }
  0x55   : > { %v261_v0 = vld [vmem:[%s1943_s13 + $0x8] sm:$0xf]  ;;  %v238_v1 = vld [vmem:[%s1943_s13] sm:$0xff]  ;;  %s1764_s23 = smov 126   ;;  %s1765_s26 = smov 127   ;;  %vm236_vm0 = vcmask 257024  }
  0x56   : > { %1739 = vsyncadd (%p2286_p1), [#allocation7], 4294966784  ;;  %269 = vrot.lane.b32.xlu1 %v261_v0, %s1764_s23  ;;  %246 = vrot.lane.b32.xlu0 %v238_v1, %s1765_s26  ;;  %v264_v2 = vcombine.high %v238_v1, %v238_v1  ;;  %234 = vst [vmem:[#allocation2] sm:$0xf] %v238_v1  ;;  %v230_v3 = vld [vmem:[%s1943_s13 + $0x8] sm:$0xf]  ;;  %v242_v6 = vcombine.low %v238_v1, %v238_v1 }
  0x57   : > { %s1766_s21 = smov 110   ;;  %v1602_v4 = vld [vmem:[%s1943_s13 + $0x8] ss:$0 sps:$4 sm:$0xff]   ;;  %237 = vst.msk [vmem:[#allocation2 + $0x10] sm:$0xf] %vm236_vm0, %v230_v3  ;;  %s1767_s28 = smov 109  }
  0x58   : > { %235 = vst [vmem:[#allocation2 + $0x8] sm:$0xf] %v264_v2  ;;  %v1603_v5 = vld [vmem:[%s1943_s13 + $0x8] ss:$0 sps:$4 sm:$0xff]   ;;  %s1768_s9 = smov 108   ;;  %s1769_s10 = smov 92  }
  0x59   : > { %v302_v7 = vld [vmem:[%s1943_s13 + $0x8] sm:$0xf]  ;;  %s1770_s14 = smov 91   ;;  %s1771_s20 = smov 90   ;;  %v1772_v12 = vmov 0.0   ;;  %v1965_v13 = vld [vmem:[#allocation6] sm:$0xff] }
  0x5a   : > { %267 = vrot.lane.b32.xlu1 %v264_v2, %s1764_s23  ;;  %288 = vrot.lane.b32.xlu0 %v238_v1, %s1766_s21  ;;  %v1604_v8 = vld [vmem:[%s1943_s13 + $0x8] ss:$0 sps:$4 sm:$0xff]   ;;  %vm422_vm1 = vcmask 293888   ;;  %vm271_vm2 = vcmask 1031168   ;;  %vm258_vm3 = vcmask 261124   ;;  %vm292_vm4 = vcmask 900096  }
  0x5b   : > { %v343_v9 = vld [vmem:[%s1943_s13 + $0x8] sm:$0xf]  ;;  %509 = vmatprep.mubr.f32.mxu0 %v1772_v12  ;;  %1480 = vmatprep.mubr.msk.f32.mxu1 %vm422_vm1, %v1965_v13  ;;  %vm250_vm5 = vcmask 1039360   ;;  %vm312_vm6 = vcmask 891904   ;;  %vm333_vm7 = vcmask 883712   ;;  %vm353_vm8 = vcmask 752640  }
  0x5c   : > { %v1605_v10 = vld [vmem:[%s1943_s13 + $0x8] ss:$0 sps:$4 sm:$0xff]   ;;  %vm374_vm9 = vcmask 744448   ;;  %vm394_vm10 = vcmask 736256   ;;  %vm435_vm11 = vcmask 1043456   ;;  %vm629_vm12 = vcmask 64512  }
  0x5d   : > { %v384_v11 = vld [vmem:[%s1943_s13 + $0x8] sm:$0xf]  ;;  %vm1774_vm13 = vmmov 0   ;;  %s1525_s29 = smul.u32 96, %s1939_s8 }
  0x5e   : > { %290 = vrot.lane.b32.xlu1 %v1602_v4, %s1766_s21  ;;  %248 = vrot.lane.b32.xlu0 %v1603_v5, %s1765_s26  ;;  %s1526_s12 = smul.u32 1536, %s1824_s19  ;;  %s1319_s19 = scalar_lea.sflag [#allocation5], %s1939_s8 }
  0x5f   : > { %s2136_s11 = scalar_lea.vmem [#allocation8], %s1525_s29 }
  0x60   : > { %s1332_s13 = sshll.u32 %s2136_s11, 4  ;;  %s2222_s13 = int_to_ptr.vmem [resolvable:$true] %s1332_s13 }
  0x62   : > { %265 = vrot.lane.b32.xlu1 %v238_v1, %s1764_s23  ;;  %244 = vrot.lane.b32.xlu0 %v242_v6, %s1765_s26 }
  0x66   : > { %308 = vrot.lane.b32.xlu1 %v264_v2, %s1767_s28  ;;  %286 = vrot.lane.b32.xlu0 %v242_v6, %s1766_s21  ;;  %s2219_s21 = scalar_lea.hbm %s2272_s4, %s1526_s12 }
  0x6a   : > { %329 = vrot.lane.b32.xlu1 %v238_v1, %s1768_s9  ;;  %310 = vrot.lane.b32.xlu0 %v302_v7, %s1767_s28 }
  0x6e   : > { %349 = vrot.lane.b32.xlu1 %v264_v2, %s1769_s10  ;;  %331 = vrot.lane.b32.xlu0 %v1604_v8, %s1768_s9 }
  0x72   : > { %370 = vrot.lane.b32.xlu1 %v238_v1, %s1770_s14  ;;  %351 = vrot.lane.b32.xlu0 %v343_v9, %s1769_s10  ;;  %v404_v9 = vld [vmem:[#allocation6 + $0x8] sm:$0xff] }
  0x76   : > { %306 = vrot.lane.b32.xlu1 %v238_v1, %s1767_s28  ;;  %372 = vrot.lane.b32.xlu0 %v1605_v10, %s1770_s14  ;;  %s1688_s28 = scalar_lea.vmem %s2222_s13, 1536 }
  0x77   : > { %p1689_p4 = scmp.ne.s32.totalorder %s2222_s13, %s1688_s28 }
  0x79   : > { %p1690_p6 = pnand %p1689_p4, %p1894_p12 }
  0x7a   : > { %347 = vrot.lane.b32.xlu1 %v238_v1, %s1769_s10  ;;  %327 = vrot.lane.b32.xlu0 %v242_v6, %s1768_s9  ;;  %s1775_s9 = smov [#allocation8]  }
  0x7b   : > { %p1691_p8 = pneg %p1690_p6  ;;  %s1692_s10 = sshll.u32 %s1775_s9, 4  ;;  %s1693_s10 = int_to_ptr.vmem [resolvable:$false] %s1692_s10 }
  0x7c   : > { %p1695_p10 = scmp.lt.s32.totalorder %s2222_s13, %s1693_s10 }
  0x7e   : > { %390 = vrot.lane.b32.xlu1 %v264_v2, %s1771_s20  ;;  %368 = vrot.lane.b32.xlu0 %v242_v6, %s1770_s14  ;;  %s1694_s14 = scalar_lea.vmem %s1693_s10, 3072 }
  0x7f   : > { %p1696_p11 = scmp.lt.s32.totalorder %s1694_s14, %s1688_s28 }
  0x81   : > { %p1697_p3 = por %p1696_p11, %p1695_p10 }
  0x82   : > { %388 = vrot.lane.b32.xlu1 %v238_v1, %s1771_s20  ;;  %392 = vrot.lane.b32.xlu0 %v384_v11, %s1771_s20 }
  0x83   : > { %p1698_p7 = pnand %p1697_p3, %p1691_p8 }
  0xc8   : > { %v270_v14 = vpop.permute.xlu1 %269  ;;  %v247_v15 = vpop.permute.xlu0 %246 }
  0xc9   : > { %279 = vst.msk [vmem:[#allocation2 + $0x28] sm:$0xf] %vm236_vm0, %v270_v14 }
  0xcc   : > { %v268_v16 = vpop.permute.xlu1 %267  ;;  %v289_v17 = vpop.permute.xlu0 %288 }
  0xcd   : > { %v273_v18 = vsel %vm271_vm2, %v268_v16, %v270_v14  ;;  %v405_v14 = vld [vmem:[#allocation6 + $0x10] sm:$0xff] }
  0xce   : > { %278 = vst [vmem:[#allocation2 + $0x20] sm:$0xf] %v273_v18 }
  0xd0   : > { %v291_v19 = vpop.permute.xlu1 %290  ;;  %v249_v20 = vpop.permute.xlu0 %248 }
  0xd1   : > { %v294_v21 = vsel %vm292_vm4, %v289_v17, %v291_v19  ;;  %300 = vst.msk [vmem:[#allocation2 + $0x28] sm:$0xf0] %vm258_vm3, %v291_v19  ;;  %v252_v22 = vsel %vm250_vm5, %v247_v15, %v249_v20  ;;  %259 = vst.msk [vmem:[#allocation2 + $0x10] sm:$0xf0] %vm258_vm3, %v249_v20 }
  0xd2   : > { %299 = vst [vmem:[#allocation2 + $0x20] sm:$0xf0] %v294_v21  ;;  %257 = vst [vmem:[#allocation2 + $0x8] sm:$0xf0] %v252_v22 }
  0xd4   : > { %v266_v23 = vpop.permute.xlu1 %265  ;;  %v245_v24 = vpop.permute.xlu0 %244 }
  0xd5   : > { %v272_v25 = vsel %vm271_vm2, %v266_v23, %v268_v16  ;;  %v251_v26 = vsel %vm250_vm5, %v245_v24, %v247_v15  ;;  %v406_v15 = vld [vmem:[#allocation6 + $0x18] sm:$0xff]  ;;  %v1773_v16 = vmov 0   ;;  %vm800_vm2 = vcmask 261120  }
  0xd6   : > { %277 = vst [vmem:[#allocation2 + $0x18] sm:$0xf] %v272_v25  ;;  %256 = vst [vmem:[#allocation2] sm:$0xf0] %v251_v26  ;;  %1599 = vset.pattern.permute.xlu0 %v1773_v16  ;;  %v619_v25 = vld [vmem:[%s2270_s2] sm:$0xff] }
  0xd8   : > { %v309_v27 = vpop.permute.xlu1 %308  ;;  %v287_v28 = vpop.permute.xlu0 %286  ;;  %v409_v29 = vld [vmem:[#allocation2 + $0x10] sm:$0xff]  ;;  %v412_v30 = vld [vmem:[#allocation2 + $0x28] sm:$0xff] }
  0xd9   : > { %v293_v31 = vsel %vm292_vm4, %v287_v28, %v289_v17  ;;  %v1514_v32 = vpack.c.bf16 %v412_v30, %v409_v29  ;;  %v408_v33 = vld [vmem:[#allocation2 + $0x8] sm:$0xff]  ;;  %v411_v34 = vld [vmem:[#allocation2 + $0x20] sm:$0xff] }
  0xda   : > { %298 = vst [vmem:[#allocation2 + $0x18] sm:$0xf0] %v293_v31  ;;  %v1506_v35 = vpack.c.bf16 %v411_v34, %v408_v33 }
  0xdb   : > { %1515 = vmatprep.subr.bf16.mxu1 %v1514_v32 }
  0xdc   : > { %v330_v36 = vpop.permute.xlu1 %329  ;;  %v311_v37 = vpop.permute.xlu0 %310  ;;  %1507 = vmatprep.subr.bf16.mxu0 %v1506_v35  ;;  %1517 = vmatpush3.bf16.msra.mxu1 %v1514_v32 }
  0xdd   : > { %v314_v38 = vsel %vm312_vm6, %v309_v27, %v311_v37  ;;  %320 = vst.msk [vmem:[#allocation2 + $0x40] sm:$0xf] %vm236_vm0, %v311_v37  ;;  %v407_v42 = vld [vmem:[#allocation2] sm:$0xff] }
  0xde   : > { %319 = vst [vmem:[#allocation2 + $0x38] sm:$0xf] %v314_v38 }
  0xe0   : > { %v350_v39 = vpop.permute.xlu1 %349  ;;  %v332_v40 = vpop.permute.xlu0 %331 }
  0xe1   : > { %v335_v41 = vsel %vm333_vm7, %v330_v36, %v332_v40  ;;  %341 = vst.msk [vmem:[#allocation2 + $0x40] sm:$0xf0] %vm258_vm3, %v332_v40  ;;  %v410_v43 = vld [vmem:[#allocation2 + $0x18] sm:$0xff] }
  0xe2   : > { %340 = vst [vmem:[#allocation2 + $0x38] sm:$0xf0] %v335_v41  ;;  %v1508_v44 = vpack.c.bf16 %v410_v43, %v407_v42 }
  0xe4   : > { %v371_v45 = vpop.permute.xlu1 %370  ;;  %v352_v46 = vpop.permute.xlu0 %351  ;;  %1509 = vmatpush1.bf16.msra.mxu0 %v1508_v44 }
  0xe5   : > { %v355_v47 = vsel %vm353_vm8, %v350_v39, %v352_v46  ;;  %361 = vst.msk [vmem:[#allocation2 + $0x58] sm:$0xf] %vm236_vm0, %v352_v46 }
  0xe6   : > { %360 = vst [vmem:[#allocation2 + $0x50] sm:$0xf] %v355_v47 }
  0xe8   : > { %v307_v48 = vpop.permute.xlu1 %306  ;;  %v373_v49 = vpop.permute.xlu0 %372  ;;  %v415_v58 = vld [vmem:[#allocation2 + $0x40] sm:$0xff] }
  0xe9   : > { %v313_v50 = vsel %vm312_vm6, %v307_v48, %v309_v27  ;;  %v376_v51 = vsel %vm374_vm9, %v371_v45, %v373_v49  ;;  %382 = vst.msk [vmem:[#allocation2 + $0x58] sm:$0xf0] %vm258_vm3, %v373_v49  ;;  %v414_v62 = vld [vmem:[#allocation2 + $0x38] sm:$0xff] }
  0xea   : > { %318 = vst [vmem:[#allocation2 + $0x30] sm:$0xf] %v313_v50  ;;  %381 = vst [vmem:[#allocation2 + $0x50] sm:$0xf0] %v376_v51 }
  0xec   : > { %v348_v52 = vpop.permute.xlu1 %347  ;;  %v328_v53 = vpop.permute.xlu0 %327 }
  0xed   : > { %v354_v54 = vsel %vm353_vm8, %v348_v52, %v350_v39  ;;  %v334_v55 = vsel %vm333_vm7, %v328_v53, %v330_v36 }
  0xee   : > { %359 = vst [vmem:[#allocation2 + $0x48] sm:$0xf] %v354_v54  ;;  %339 = vst [vmem:[#allocation2 + $0x30] sm:$0xf0] %v334_v55 }
  0xf0   : > { %v391_v56 = vpop.permute.xlu1 %390  ;;  %v369_v57 = vpop.permute.xlu0 %368  ;;  %v418_v59 = vld [vmem:[#allocation2 + $0x58] sm:$0xff] }
  0xf1   : > { %v375_v60 = vsel %vm374_vm9, %v369_v57, %v371_v45  ;;  %v1518_v61 = vpack.c.bf16 %v418_v59, %v415_v58  ;;  %v417_v63 = vld [vmem:[#allocation2 + $0x50] sm:$0xff] }
  0xf2   : > { %380 = vst [vmem:[#allocation2 + $0x48] sm:$0xf0] %v375_v60  ;;  %v1510_v0 = vpack.c.bf16 %v417_v63, %v414_v62 }
  0xf3   : > { %1519 = vmatprep.subr.bf16.mxu1 %v1518_v61 }
  0xf4   : > { %v389_v1 = vpop.permute.xlu1 %388  ;;  %v393_v2 = vpop.permute.xlu0 %392  ;;  %1511 = vmatprep.subr.bf16.mxu0 %v1510_v0  ;;  %1521 = vmatpush3.bf16.msra.mxu1 %v1518_v61 }
  0xf5   : > { %v395_v3 = vsel %vm394_vm10, %v389_v1, %v391_v56  ;;  %v396_v4 = vsel %vm394_vm10, %v391_v56, %v393_v2  ;;  %402 = vst.msk [vmem:[#allocation2 + $0x70] sm:$0xf] %vm236_vm0, %v393_v2  ;;  %v413_v5 = vld [vmem:[#allocation2 + $0x30] sm:$0xff] }
  0xf6   : > { %400 = vst [vmem:[#allocation2 + $0x60] sm:$0xf] %v395_v3  ;;  %401 = vst [vmem:[#allocation2 + $0x68] sm:$0xf] %v396_v4 }
  0xf9   : > { %v416_v6 = vld [vmem:[#allocation2 + $0x48] sm:$0xff] }
  0xfa   : > { %v1512_v7 = vpack.c.bf16 %v416_v6, %v413_v5 }
  0xfc   : > { %1513 = vmatpush1.bf16.msra.mxu0 %v1512_v7  ;;  %v421_v8 = vld [vmem:[#allocation2 + $0x70] sm:$0xf] }
  0xfd   : > { %1478 = vmatprep.subr.msk.mxu1 %vm435_vm11, %v421_v8  ;;  %v420_v10 = vld [vmem:[#allocation2 + $0x68] sm:$0xf]  ;;  %v419_v11 = vld [vmem:[#allocation2 + $0x60] sm:$0xf] }
  0xfe   : > { %1422 = vmatprep.subr.msk.mxu0 %vm435_vm11, %v420_v10  ;;  %1479 = vmatpush3.msk.msra.mxu1 %vm435_vm11, %v421_v8 }
  0xff   : > { %1481 = vmatmul.mubr.msk.f32.vlgmr.msra.gmra.mrb[0].mxu1 %vm422_vm1, %v404_v9 }
 0x100   : > { %1423 = vmatpush1.msk.msra.mxu0 %vm435_vm11, %v419_v11  ;;  %1483 = vmatprep.mubr.msk.f32.mxu1 %vm422_vm1, %v405_v14 }
 0x101   : > { %1424 = vmatmul.mubr.msk.f32.vlgmr.msra.gmra.mrb[0].mxu0 %vm422_vm1, %v1965_v13  ;;  %v620_v13 = vld [vmem:[%s2271_s3] sm:$0xff] }
 0x102   : > { %515 = vmatprep.mubr.f32.mxu0 %v1772_v12  ;;  %626 = vperm.xlu0 %1599, %v620_v13  }
 0x103   : > { %1484 = vmatmul.mubr.msk.f32.gmra.mrb[2].mxu1 %vm422_vm1, %v406_v15 }
 0x104   : > { %697 = vmatprep.mubr.f32.mxu1 %v1772_v12 }
 0x105   : > { %1425 = vmatmul.mubr.msk.f32.gmra.mrb[2].mxu0 %vm422_vm1, %v404_v9 }
 0x106   : > { %521 = vmatprep.mubr.f32.mxu0 %v1772_v12 }
 0x109   : > { %1426 = vmatmul.mubr.msk.f32.gmra.mrb[4].mxu0 %vm422_vm1, %v405_v14 }
 0x10a   : > { %527 = vmatprep.mubr.f32.mxu0 %v1772_v12 }
 0x10d   : > { %1427 = vmatmul.mubr.msk.f32.gmra.mrb[6].mxu0 %vm422_vm1, %v406_v15 }
 0x10e   : > { %869 = vmatprep.mubr.f32.mxu0 %v1772_v12 }
 0x181   : > { %v2078_v42 = vpop.permute.xlu0 %626 }
 0x1d2   : > { %v2005_v17 = vpop.f32.mrb[0].mxu1 }
 0x1d3   : > { %v2007_v18 = vpop.f32.mrb[1].mxu1  ;;  %v804_v32 = vmul.f32 %v2005_v17, %v2005_v17 }
 0x1d4   : > { %v2009_v19 = vpop.f32.mrb[0].mxu0  ;;  %v623_v24 = vmul.f32 %v2007_v18, %v2007_v18 }
 0x1d5   : > { %v2011_v20 = vpop.f32.mrb[1].mxu0  ;;  %v621_v23 = vmul.f32 %v2009_v19, %v2009_v19 }
 0x1d6   : > { %v622_v21 = vmul.f32 %v2011_v20, %v2011_v20  ;;  %v2015_v22 = vpop.f32.mrb[2].mxu1 }
 0x1d7   : > { %v2024_v26 = vpop.f32.mrb[3].mxu1  ;;  %v1148_v41 = vmul.f32 %v2015_v22, %v2015_v22 }
 0x1d8   : > { %v2026_v27 = vpop.f32.mrb[2].mxu0  ;;  %633 = vmatprep.subr.mxu1 %v622_v21  ;;  %v976_v36 = vmul.f32 %v2024_v26, %v2024_v26 }
 0x1d9   : > { %v802_v28 = vmul.f32 %v2026_v27, %v2026_v27  ;;  %v2030_v29 = vpop.f32.mrb[3].mxu0  ;;  %634 = vmatpush1.msra.mxu1 %v621_v23 }
 0x1da   : > { %v803_v30 = vmul.f32 %v2030_v29, %v2030_v29  ;;  %1433 = vmatmul.mubr.msk.f32.vlgmr.msra.gmra.mrb[4].mxu1 %vm629_vm12, %v619_v25  ;;  %1486 = vmatprep.subr.mxu1 %v1772_v12 }
 0x1db   : > { %1487 = vmatpush3.msra.mxu1 %v623_v24  ;;  %1488 = vmatprep.mubr.msk.f32.mxu1 %vm1774_vm13, %v1772_v12 }
 0x1dc   : > { %v2038_v31 = vpop.f32.mrb[4].mxu0  ;;  %805 = vmatprep.subr.mxu0 %v803_v30  ;;  %1491 = vmatprep.subr.mxu1 %v1772_v12 }
 0x1dd   : > { %v974_v33 = vmul.f32 %v2038_v31, %v2038_v31  ;;  %v2045_v34 = vpop.f32.mrb[5].mxu0  ;;  %806 = vmatpush1.msra.mxu0 %v802_v28 }
 0x1de   : > { %v975_v35 = vmul.f32 %v2045_v34, %v2045_v34  ;;  %1489 = vmatmul.mubr.msk.f32.vlgmr.msra.gmra.mrb[6].mxu1 %vm629_vm12, %v619_v25  ;;  %1435 = vmatmul.mubr.msk.f32.vlgmr.msra.gmra.mrb[8].mxu0 %vm629_vm12, %v619_v25 }
 0x1df   : > { %1492 = vmatpush3.msra.mxu1 %v804_v32  ;;  %1493 = vmatprep.mubr.msk.f32.mxu1 %vm1774_vm13, %v1772_v12 }
 0x1e0   : > { %v2055_v37 = vpop.f32.mrb[6].mxu0  ;;  %977 = vmatprep.subr.mxu0 %v975_v35  ;;  %1041 = vmatprep.mubr.f32.mxu0 %v1772_v12 }
 0x1e1   : > { %v1146_v38 = vmul.f32 %v2055_v37, %v2055_v37  ;;  %v2060_v39 = vpop.f32.mrb[7].mxu0  ;;  %978 = vmatpush1.msra.mxu0 %v974_v33  ;;  %1496 = vmatprep.subr.mxu1 %v1772_v12 }
 0x1e2   : > { %v1147_v40 = vmul.f32 %v2060_v39, %v2060_v39  ;;  %1494 = vmatmul.mubr.msk.f32.vlgmr.msra.gmra.mrb[8].mxu1 %vm629_vm12, %v619_v25  ;;  %1440 = vmatmul.mubr.msk.f32.vlgmr.msra.gmra.mrb[10].mxu0 %vm629_vm12, %v619_v25 }
 0x1e3   : > { %1497 = vmatpush3.msra.mxu1 %v976_v36  ;;  %1498 = vmatprep.mubr.msk.f32.mxu1 %vm1774_vm13, %v1772_v12 }
 0x1e4   : > { %1149 = vmatprep.subr.mxu0 %v1147_v40  ;;  %1213 = vmatprep.mubr.f32.mxu0 %v1772_v12 }
 0x1e5   : > { %1150 = vmatpush1.msra.mxu0 %v1146_v38  ;;  %1501 = vmatprep.subr.mxu1 %v1772_v12 }
 0x1e6   : > { %1499 = vmatmul.mubr.msk.f32.vlgmr.msra.gmra.mrb[10].mxu1 %vm629_vm12, %v619_v25  ;;  %1445 = vmatmul.mubr.msk.f32.vlgmr.msra.gmra.mrb[12].mxu0 %vm629_vm12, %v619_v25 }
 0x1e7   : > { %1502 = vmatpush3.msra.mxu1 %v1148_v41  ;;  %1503 = vmatprep.mubr.msk.f32.mxu1 %vm1774_vm13, %v1772_v12 }
 0x1ea   : > { %1504 = vmatmul.mubr.msk.f32.vlgmr.msra.gmra.mrb[12].mxu1 %vm629_vm12, %v619_v25 }
 0x2ad   : > { %v699_v43 = vpop.f32.mrb[4].mxu1 }
 0x2ae   : > { %v700_v44 = vadd.f32 %v699_v43, %v2078_v42  ;;  %v701_v45 = vpop.f32.mrb[5].mxu1 }
 0x2af   : > { %v702_v46 = vadd.f32 %v701_v45, %v2078_v42 }
 0x2b0   : > { %1606 = vrsqrt.f32 %v700_v44  ;;  %vm776_vm14 = vcmp.eq.f32.partialorder %v700_v44, inf  ;;  %vm778_vm15 = vcmp.eq.f32.partialorder %v700_v44, 0.0  ;;  %v779_v60 = vand.u32 2147483648, %v700_v44 }
 0x2b1   : > { %1608 = vrsqrt.f32 %v702_v46  ;;  %v770_v47 = vpop.f32.mrb[6].mxu1  ;;  %v871_v48 = vpop.f32.mrb[8].mxu0  ;;  %vm783_vm0 = vcmp.eq.f32.partialorder %v702_v46, inf  ;;  %vm785_vm1 = vcmp.eq.f32.partialorder %v702_v46, 0.0  ;;  %v786_v0 = vand.u32 2147483648, %v702_v46 }
 0x2b2   : > { %v2083_v49 = vadd.f32 %v770_v47, %v2078_v42  ;;  %v2086_v50 = vadd.f32 %v871_v48, %v2078_v42  ;;  %v873_v12 = vpop.f32.mrb[9].mxu0  ;;  %v1490_v51 = vpop.f32.mrb[7].mxu1 }
 0x2b3   : > { %v2089_v52 = vadd.f32 %v873_v12, %v2078_v42 }
 0x2b4   : > { %1610 = vrsqrt.f32 %v2083_v49  ;;  %vm790_vm3 = vcmp.eq.f32.partialorder %v2083_v49, inf  ;;  %vm792_vm4 = vcmp.eq.f32.partialorder %v2083_v49, 0.0  ;;  %v793_v6 = vand.u32 2147483648, %v2083_v49 }
 0x2b5   : > { %1612 = vrsqrt.f32 %v2086_v50  ;;  %v942_v53 = vpop.f32.mrb[8].mxu1  ;;  %v1043_v54 = vpop.f32.mrb[10].mxu0  ;;  %vm948_vm5 = vcmp.eq.f32.partialorder %v2086_v50, inf  ;;  %vm950_vm6 = vcmp.eq.f32.partialorder %v2086_v50, 0.0  ;;  %v951_v10 = vand.u32 2147483648, %v2086_v50 }
 0x2b6   : > { %1614 = vrsqrt.f32 %v2089_v52  ;;  %v1045_v55 = vpop.f32.mrb[11].mxu0  ;;  %v1495_v56 = vpop.f32.mrb[9].mxu1  ;;  %v2095_v57 = vadd.f32 %v942_v53, %v2078_v42  ;;  %v2098_v58 = vadd.f32 %v1043_v54, %v2078_v42  ;;  %vm955_vm7 = vcmp.eq.f32.partialorder %v2089_v52, inf }
 0x2b7   : > { %v2101_v59 = vadd.f32 %v1045_v55, %v2078_v42  ;;  %vm957_vm8 = vcmp.eq.f32.partialorder %v2089_v52, 0.0 }
 0x2b8   : > { %1616 = vrsqrt.f32 %v2095_v57  ;;  %vm962_vm9 = vcmp.eq.f32.partialorder %v2095_v57, inf  ;;  %vm964_vm10 = vcmp.eq.f32.partialorder %v2095_v57, 0.0  ;;  %v965_v45 = vand.u32 2147483648, %v2095_v57 }
 0x2b9   : > { %v1114_v61 = vpop.f32.mrb[10].mxu1  ;;  %v1215_v62 = vpop.f32.mrb[12].mxu0  ;;  %1618 = vrsqrt.f32 %v2098_v58  ;;  %vm1120_vm11 = vcmp.eq.f32.partialorder %v2098_v58, inf  ;;  %vm1122_vm12 = vcmp.eq.f32.partialorder %v2098_v58, 0.0  ;;  %vm1127_vm13 = vcmp.eq.f32.partialorder %v2101_v59, inf }
 0x2ba   : > { %v1607_v63 = vpop.eup %1606  ;;  %v1217_v1 = vpop.f32.mrb[13].mxu0  ;;  %1620 = vrsqrt.f32 %v2101_v59  ;;  %v2111_v7 = vadd.f32 %v1114_v61, %v2078_v42  ;;  %v2114_v8 = vadd.f32 %v1215_v62, %v2078_v42 }
 0x2bb   : > { %v1500_v2 = vpop.f32.mrb[11].mxu1  ;;  %v1609_v3 = vpop.eup %1608  ;;  %v775_v4 = vmul.f32 %v1607_v63, %v700_v44  ;;  %v2124_v16 = vadd.f32 %v1217_v1, %v2078_v42 }
 0x2bc   : > { %v782_v5 = vmul.f32 %v1609_v3, %v702_v46  ;;  %1622 = vrsqrt.f32 %v2111_v7 }
 0x2bd   : > { %v777_v9 = vsel %vm776_vm14, %v700_v44, %v775_v4  ;;  %v1286_v11 = vpop.f32.mrb[12].mxu1  ;;  %1624 = vrsqrt.f32 %v2114_v8  ;;  %vm1129_vm14 = vcmp.eq.f32.partialorder %v2101_v59, 0.0 }
 0x2be   : > { %v1611_v14 = vpop.eup %1610  ;;  %v780_v15 = vsel %vm778_vm15, %v779_v60, %v777_v9  ;;  %v784_v13 = vsel %vm783_vm0, %v702_v46, %v782_v5  ;;  %v1505_v21 = vpop.f32.mrb[13].mxu1  ;;  %1626 = vrsqrt.f32 %v2124_v16  ;;  %v1287_v51 = vadd.f32 %v1286_v11, %v2078_v42 }
 0x2bf   : > { %v1613_v23 = vpop.eup %1612  ;;  %v795_v24 = vmul.f32 %v780_v15, %v2009_v19  ;;  %v787_v25 = vsel %vm785_vm1, %v786_v0, %v784_v13  ;;  %v789_v28 = vmul.f32 %v1611_v14, %v2083_v49  ;;  %v1130_v42 = vand.u32 2147483648, %v2101_v59 }
 0x2c0   : > { %v1615_v30 = vpop.eup %1614  ;;  %v796_v32 = vmul.f32 %v787_v25, %v2011_v20  ;;  %v947_v33 = vmul.f32 %v1613_v23, %v2086_v50  ;;  %v958_v20 = vand.u32 2147483648, %v2089_v52  ;;  %1628 = vrsqrt.f32 %v1287_v51 }
 0x2c1   : > { %798 = vst [vmem:[%s2136_s11] sm:$0xff] %v795_v24  ;;  %v791_v19 = vsel %vm790_vm3, %v2083_v49, %v789_v28  ;;  %v954_v35 = vmul.f32 %v1615_v30, %v2089_v52  ;;  %vm1134_vm15 = vcmp.eq.f32.partialorder %v2111_v7, inf  ;;  %vm1136_vm0 = vcmp.eq.f32.partialorder %v2111_v7, 0.0 }
 0x2c2   : > { %799 = vst [vmem:[%s2136_s11 + $0x8] sm:$0xff] %v796_v32  ;;  %v794_v36 = vsel %vm792_vm4, %v793_v6, %v791_v19  ;;  %v949_v38 = vsel %vm948_vm5, %v2086_v50, %v947_v33  ;;  %v1617_v40 = vpop.eup %1616  ;;  %vm1292_vm1 = vcmp.eq.f32.partialorder %v2114_v8, inf  ;;  %vm1294_vm3 = vcmp.eq.f32.partialorder %v2114_v8, 0.0 }
 0x2c3   : > { %v797_v41 = vmul.f32 %v794_v36, %v2007_v18  ;;  %v952_v43 = vsel %vm950_vm6, %v951_v10, %v949_v38  ;;  %v956_v44 = vsel %vm955_vm7, %v2089_v52, %v954_v35  ;;  %v1619_v46 = vpop.eup %1618  ;;  %v961_v49 = vmul.f32 %v1617_v40, %v2095_v57 }
 0x2c4   : > { %v967_v47 = vmul.f32 %v952_v43, %v2026_v27  ;;  %v959_v48 = vsel %vm957_vm8, %v958_v20, %v956_v44  ;;  %v1621_v18 = vpop.eup %1620  ;;  %v1119_v12 = vmul.f32 %v1619_v46, %v2098_v58  ;;  %v1123_v52 = vand.u32 2147483648, %v2098_v58 }
 0x2c5   : > { %801 = vst.msk [vmem:[%s2136_s11 + $0x10] sm:$0xff] %vm800_vm2, %v797_v41  ;;  %v968_v50 = vmul.f32 %v959_v48, %v2030_v29  ;;  %v963_v27 = vsel %vm962_vm9, %v2095_v57, %v961_v49  ;;  %v1126_v53 = vmul.f32 %v1621_v18, %v2101_v59  ;;  %vm1299_vm4 = vcmp.eq.f32.partialorder %v2124_v16, inf }
 0x2c6   : > { %1437 = vst [vmem:[%s2136_s11 + $0x18] sm:$0xff] %v967_v47  ;;  %v966_v29 = vsel %vm964_vm10, %v965_v45, %v963_v27  ;;  %v1121_v54 = vsel %vm1120_vm11, %v2098_v58, %v1119_v12  ;;  %v1623_v55 = vpop.eup %1622  ;;  %vm1301_vm5 = vcmp.eq.f32.partialorder %v2124_v16, 0.0  ;;  %vm1306_vm6 = vcmp.eq.f32.partialorder %v1287_v51, inf }
 0x2c7   : > { %1438 = vst [vmem:[%s2136_s11 + $0x20] sm:$0xff] %v968_v50  ;;  %v969_v56 = vmul.f32 %v2005_v17, %v966_v29  ;;  %v1124_v60 = vsel %vm1122_vm12, %v1123_v52, %v1121_v54  ;;  %v1128_v61 = vsel %vm1127_vm13, %v2101_v59, %v1126_v53  ;;  %v1133_v57 = vmul.f32 %v1623_v55, %v2111_v7  ;;  %v1625_v0 = vpop.eup %1624 }
 0x2c8   : > { %v1139_v62 = vmul.f32 %v1124_v60, %v2038_v31  ;;  %v1131_v63 = vsel %vm1129_vm14, %v1130_v42, %v1128_v61  ;;  %v1137_v17 = vand.u32 2147483648, %v2111_v7  ;;  %v1291_v31 = vmul.f32 %v1625_v0, %v2114_v8  ;;  %v1627_v59 = vpop.eup %1626 }
 0x2c9   : > { %1439 = vst.msk [vmem:[%s2136_s11 + $0x28] sm:$0xff] %vm800_vm2, %v969_v56  ;;  %v1140_v58 = vmul.f32 %v1131_v63, %v2045_v34  ;;  %v1135_v1 = vsel %vm1134_vm15, %v2111_v7, %v1133_v57  ;;  %v1295_v34 = vand.u32 2147483648, %v2114_v8  ;;  %v1298_v5 = vmul.f32 %v1627_v59, %v2124_v16 }
 0x2ca   : > { %1442 = vst [vmem:[%s2136_s11 + $0x30] sm:$0xff] %v1139_v62  ;;  %v1138_v2 = vsel %vm1136_vm0, %v1137_v17, %v1135_v1  ;;  %v1293_v4 = vsel %vm1292_vm1, %v2114_v8, %v1291_v31  ;;  %v1302_v7 = vand.u32 2147483648, %v2124_v16  ;;  %v1629_v11 = vpop.eup %1628  ;;  %v1309_v15 = vand.u32 2147483648, %v1287_v51 }
 0x2cb   : > { %1443 = vst [vmem:[%s2136_s11 + $0x38] sm:$0xff] %v1140_v58  ;;  %v1141_v3 = vmul.f32 %v1138_v2, %v2024_v26  ;;  %v1296_v6 = vsel %vm1294_vm3, %v1295_v34, %v1293_v4  ;;  %v1300_v10 = vsel %vm1299_vm4, %v2124_v16, %v1298_v5  ;;  %v1305_v14 = vmul.f32 %v1629_v11, %v1287_v51 }
 0x2cc   : > { %v1311_v9 = vmul.f32 %v1296_v6, %v2055_v37  ;;  %v1303_v26 = vsel %vm1301_vm5, %v1302_v7, %v1300_v10  ;;  %vm1308_vm7 = vcmp.eq.f32.partialorder %v1287_v51, 0.0 }
 0x2cd   : > { %1444 = vst.msk [vmem:[%s2136_s11 + $0x40] sm:$0xff] %vm800_vm2, %v1141_v3  ;;  %v1312_v8 = vmul.f32 %v1303_v26, %v2060_v39  ;;  %v1307_v13 = vsel %vm1306_vm6, %v1287_v51, %v1305_v14 }
 0x2ce   : > { %1447 = vst [vmem:[%s2136_s11 + $0x48] sm:$0xff] %v1311_v9  ;;  %v1310_v37 = vsel %vm1308_vm7, %v1309_v15, %v1307_v13 }
 0x2cf   : > { %1448 = vst [vmem:[%s2136_s11 + $0x50] sm:$0xff] %v1312_v8  ;;  %v1313_v16 = vmul.f32 %v2015_v22, %v1310_v37 }
 0x2d1   : > { %1449 = vst.msk [vmem:[%s2136_s11 + $0x58] sm:$0xff] %vm800_vm2, %v1313_v16 }
 0x2d2   : > { %1701 = shalt.err (!%p1698_p7)
}
 0x2d3   : > { %s1702_s20 = scalar_lea.hbm %s2219_s21, 1536  ;;  %s1706_s7 = scalar_lea.hbm %s2272_s4, 3072 }
 0x2d4   : > { %p1703_p9 = scmp.ne.s32.totalorder %s2219_s21, %s1702_s20  ;;  %p1707_p0 = scmp.lt.u32.totalorder %s2219_s21, %s2272_s4 }
 0x2d5   : > { %p1708_p13 = scmp.lt.u32.totalorder %s1706_s7, %s1702_s20  ;;  %p1710_p4 = scmp.lt.u32.totalorder %s1702_s20, %s2219_s21 }
 0x2d6   : > { %p1704_p2 = pnand %p1703_p9, %p1894_p12 }
 0x2d7   : > { %p1709_p1 = por %p1708_p13, %p1707_p0 }
 0x2d8   : > { %p1705_p5 = pneg %p1704_p2 }
 0x2d9   : > { %p1711_p6 = por %p1710_p4, %p1709_p1 }
 0x2db   : > { %p1712_p8 = pnand %p1711_p6, %p1705_p5 }
 0x2dd   : > { %1715 = shalt.err (!%p1712_p8)
}
 0x2de   : > { %s1776_s11 = smov 384   ;;  %s1777_s12 = smov 24  }
 0x2df   : > { %1533 = dma.vmem_to_hbm [thread:$0]  (%p1894_p12), %s2222_s13, 1536, %s2219_s21, %s1319_s19, %s1776_s11, %s1776_s11, %s1777_s12  }
 0x2e0 PF: > { %s1347_s23 = sand.u32 1, %s1746_s15   ;;  %p2287_p10 = scmp.ne.s32.totalorder %s2277_s22, 0 }
 0x2e1   : > { %p2288_p11 = scmp.ge.s32.totalorder %s1758_s18, 2  ;;  %s1348_s26 = scalar_lea.sflag [#allocation5], %s1347_s23 }
 0x2e3   : > { %p1544_p3 = pnand %p2288_p11, %p2287_p10 }
 0x2e5   : > { %1741 = dma.done.wait (!%p1544_p3), %s1348_s26, 1536  }
 0x2e6   : > { %1743 = vsyncadd (!%p1544_p3), %s1348_s26, 4294965760  ;;  %p18_p7 = scmp.ge.s32.totalorder %s1859_s27, 4   ;;  %s2289_s15 = smov %s1750_s16 }
 0x2e7   : > { %s2290_s16 = smov %s1754_s17  ;;  %s2291_s17 = smov %s1890_s24 }
 0x2e8   : > { %s2292_s18 = smov %s1859_s27  ;;  %20 = sbr.rel (!%p18_p7) target bundleno = 6 (0x6), region = 88 }
 0x2ef   :  { %1353 = vsyncpa [#allocation4], 1 }
 0x2f0   :  { %1355 = vsyncpa [#allocation4 + $0x1], 1 }
 0x2f1   :  { %1356 = vsyncpa [#allocation7], 1 }
 0x2f2   :  { %1357 = vsyncpa [#allocation5], 1 }
 0x2f3   :  { %1359 = vsyncpa [#allocation5 + $0x1], 1 }

</bundles_post_ra>
